<compile_context>
chip_gen: v6e
topology: v6e:2x2x1
jax: 0.10.0
libtpu: 0.0.40
codegen_flags: <defaults>
</compile_context>

<pallas_src>
import functools

import jax
import jax.numpy as jnp
from jax import lax
from jax.experimental import pallas as pl
from jax.experimental.pallas import tpu as pltpu

THRESH = 0.5


# ---------------------------------------------------------------------------
# Fused kernel: conv-as-matmul (pool folded into the weight) + LIF recurrence.
#   grid = (pixel tiles [parallel], T [arbitrary])
#   syn   = W_pool @ patches[t] + b            (one MXU dot, f32 accumulate)
#   mem   = carry + syn
#   spike = (mem > thresh)                      -> output (already in {0,1}, no clamp)
#   carry = where(spike, 0, mem * sigmoid(decay))
# ---------------------------------------------------------------------------
def _liaf_fused_kernel(sd_ref, w_ref, b_ref, p_ref, o_ref, carry_ref):
    t = pl.program_id(1)

    @pl.when(t == 0)
    def _():
        carry_ref[...] = jnp.zeros_like(carry_ref)

    syn = jnp.dot(w_ref[...], p_ref[0],
                  preferred_element_type=jnp.float32) + b_ref[...]
    mem = carry_ref[...] + syn
    spike = mem > THRESH
    o_ref[0] = spike.astype(o_ref.dtype)
    carry_ref[...] = jnp.where(spike, 0.0, mem * sd_ref[0, 0])


def _build_pooled_patches(x, w, *, stride=1, padding=1, p_kernel=2, p_stride=2):
    """im2col with the 2x2 avg-pool folded in (layout plumbing, runs in XLA).

    x: (B, Cin, T, H, W); w: (Cout, Cin, KH, KW)
    Returns:
      patches (T, Q*K, B*Hp*Wp) bf16 with Q = p_kernel^2, K = Cin*KH*KW
      w_pool  (Cout, Q*K) bf16 == tile(w_flat, Q) / Q   (so one dot == conv + avg-pool)
      (Hp, Wp) pooled spatial size.
    """
    B, Cin, T, H, W = x.shape
    Cout, _, KH, KW = w.shape
    Hc = (H + 2 * padding - KH) // stride + 1
    Wc = (W + 2 * padding - KW) // stride + 1
    Hp = (Hc - p_kernel) // p_stride + 1
    Wp = (Wc - p_kernel) // p_stride + 1
    K = Cin * KH * KW
    Q = p_kernel * p_kernel

    x_pad = jnp.pad(x, ((0, 0), (0, 0), (0, 0),
                        (padding, padding), (padding, padding)))

    # Tap (dy,dx,kh,kw) at pooled output (yp,xp) reads
    #   x_pad[..., (yp*p_stride+dy)*stride + kh, (xp*p_stride+dx)*stride + kw]
    qtaps = []
    for dy in range(p_kernel):
        for dx in range(p_kernel):
            ktaps = []
            for kh in range(KH):
                for kw in range(KW):
                    y0 = dy * stride + kh
                    x0 = dx * stride + kw
                    ys = p_stride * stride
                    tap = x_pad[:, :, :,
                                y0:y0 + ys * Hp:ys,
                                x0:x0 + ys * Wp:ys]          # (B, Cin, T, Hp, Wp)
                    ktaps.append(tap)
            qtaps.append(jnp.stack(ktaps, axis=2))           # (B, Cin, KH*KW, T, Hp, Wp)
    patches = jnp.stack(qtaps, axis=0)                        # (Q, B, Cin, KH*KW, T, Hp, Wp)
    patches = jnp.transpose(patches, (4, 0, 2, 3, 1, 5, 6))   # (T, Q, Cin, KH*KW, B, Hp, Wp)
    patches = patches.reshape(T, Q * K, B * Hp * Wp).astype(jnp.bfloat16)

    w_flat = w.reshape(Cout, K).astype(jnp.float32)
    w_pool = (jnp.tile(w_flat, (1, Q)) / float(Q)).astype(jnp.bfloat16)
    return patches, w_pool, (Hp, Wp)


@functools.partial(jax.jit, static_argnames=("stride", "padding", "p_kernel", "p_stride"))
def liaf_conv_cell_forward(x, w, b, decay, *, stride=1, padding=1, p_kernel=2, p_stride=2):
    """LIAFConvCell.forward (default args). x: (B, Cin, T, H, W) -> (B, Cout, T, Hp, Wp)."""
    B, Cin, T, H, W = x.shape
    Cout = w.shape[0]

    patches, w_pool, (Hp, Wp) = _build_pooled_patches(
        x, w, stride=stride, padding=padding, p_kernel=p_kernel, p_stride=p_stride)
    QK = patches.shape[1]
    L = B * Hp * Wp

    # Lane-dense output: pad the flattened pixel axis to a multiple of 128.
    Lp = -(-L // 128) * 128
    if Lp != L:
        patches = jnp.pad(patches, ((0, 0), (0, 0), (0, Lp - L)))

    # Pixel-tile width: multiple of 128, <= 512, and >= 2 tiles whenever possible so the
    # "parallel" grid axis can shard across both TensorCores on v7x.
    n = Lp // 128
    if n >= 8 and n % 4 == 0:
        TL = 512
    elif n >= 4 and n % 2 == 0:
        TL = 256
    else:
        TL = 128

    b_col = b.reshape(Cout, 1).astype(jnp.float32)
    sd = jax.nn.sigmoid(decay.astype(jnp.float32)).reshape(1, 1)   # sigmoid(decay), scalar

    out = pl.pallas_call(
        _liaf_fused_kernel,
        out_shape=jax.ShapeDtypeStruct((T, Cout, Lp), jnp.float32),
        grid_spec=pltpu.PrefetchScalarGridSpec(
            num_scalar_prefetch=0,
            grid=(Lp // TL, T),
            in_specs=[
                pl.BlockSpec((1, 1), lambda l, t: (0, 0),
                             memory_space=pltpu.SMEM),             # sigmoid(decay)
                pl.BlockSpec((Cout, QK), lambda l, t: (0, 0)),     # pool-folded weights (bf16)
                pl.BlockSpec((Cout, 1), lambda l, t: (0, 0)),      # conv bias (f32)
                pl.BlockSpec((1, QK, TL), lambda l, t: (t, 0, l)),  # im2col patch tile (bf16)
            ],
            out_specs=pl.BlockSpec((1, Cout, TL), lambda l, t: (t, 0, l)),
            scratch_shapes=[pltpu.VMEM((Cout, TL), jnp.float32)],   # membrane carry
        ),
        compiler_params=pltpu.CompilerParams(
            dimension_semantics=("parallel", "arbitrary"),
        ),
    )(sd, w_pool, b_col, patches)

    out = out[:, :, :L].reshape(T, Cout, B, Hp, Wp)
    return jnp.transpose(out, (2, 1, 0, 3, 4))                     # (B, Cout, T, Hp, Wp)


# ---------------------------------------------------------------------------
# References for verification.
# ---------------------------------------------------------------------------
def _reference_forward(x, w, b, decay, *, stride=1, padding=1, thresh=0.5):
    """Pure-JAX f32 reference mirroring the PyTorch forward (lax.conv based)."""
    B, Cin, T, H, W = x.shape
    Cout, _, KH, KW = w.shape
    x_bt = jnp.transpose(x, (0, 2, 1, 3, 4)).reshape(B * T, Cin, H, W)
    conv = lax.conv_general_dilated(
        x_bt, w, window_strides=(stride, stride),
        padding=[(padding, padding), (padding, padding)],
        dimension_numbers=("NCHW", "OIHW", "NCHW"),
    ) + b[None, :, None, None]
    Hc, Wc = conv.shape[2], conv.shape[3]
    conv = conv.reshape(B, T, Cout, Hc, Wc)
    Hp, Wp = Hc // 2, Wc // 2
    pooled = conv[:, :, :, :Hp * 2, :Wp * 2].reshape(B, T, Cout, Hp, 2, Wp, 2).mean(axis=(4, 6))
    pooled = jnp.transpose(pooled, (0, 2, 1, 3, 4))                # (B, Cout, T, Hp, Wp)

    sd = jax.nn.sigmoid(decay)[0]
    carry = jnp.zeros((B, Cout, Hp, Wp), jnp.float32)
    outs = []
    for t in range(T):
        mem = carry + pooled[:, :, t]
        spike = (mem > thresh).astype(jnp.float32)
        outs.append(spike)
        carry = mem * sd * (1.0 - spike)
    return jnp.clip(jnp.stack(outs, axis=2), 0.0, 1.0)


def _matched_reference(x, w, b, decay, *, stride=1, padding=1, thresh=0.5):
    """Reference using the kernel's exact bf16-operand / f32-accumulate conv rounding."""
    B, Cin, T, H, W = x.shape
    Cout = w.shape[0]
    patches, w_pool, (Hp, Wp) = _build_pooled_patches(x, w, stride=stride, padding=padding)
    syn = jnp.einsum("ok,tkm->tom", w_pool, patches,
                     preferred_element_type=jnp.float32) + b.reshape(1, Cout, 1)
    sd = jax.nn.sigmoid(decay.astype(jnp.float32))[0]
    carry = jnp.zeros((Cout, B * Hp * Wp), jnp.float32)
    outs = []
    for t in range(T):
        mem = carry + syn[t]
        outs.append((mem > thresh).astype(jnp.float32))
        carry = jnp.where(mem > thresh, 0.0, mem * sd)
    out = jnp.stack(outs, axis=0).reshape(T, Cout, B, Hp, Wp)
    return jnp.transpose(out, (2, 1, 0, 3, 4))


if __name__ == "__main__":
    # Small shapes consistent with LIAFConvCell's (B, C, T, H, W) input.
    B, Cin, T, H, W = 2, 4, 8, 16, 16
    Cout, KH, KW = 8, 3, 3

    key = jax.random.PRNGKey(0)
    kx, kw = jax.random.split(key)
    x = jax.random.normal(kx, (B, Cin, T, H, W), dtype=jnp.float32)

    # paramInit: kaiming-normal conv weights (std = sqrt(2 / fan_in)), bias = 0.5;
    # decay parameter initialized to 0.5 (norm_decay applies a sigmoid to it).
    fan_in = Cin * KH * KW
    w = jax.random.normal(kw, (Cout, Cin, KH, KW), dtype=jnp.float32) * jnp.sqrt(2.0 / fan_in)
    b = jnp.full((Cout,), 0.5, dtype=jnp.float32)
    decay = jnp.full((1,), 0.5, dtype=jnp.float32)

    out = liaf_conv_cell_forward(x, w, b, decay)
    out = jax.block_until_ready(out)

    Hp, Wp = H // 2, W // 2
    assert out.shape == (B, Cout, T, Hp, Wp)

    # Check 1: matched-precision reference (same bf16 operands, f32 accumulation). Only
    # accumulation-order differences remain, so spike mismatches should be essentially zero.
    ref_m = _matched_reference(x, w, b, decay)
    mm_matched = float(jnp.mean((out != ref_m).astype(jnp.float32)))
    assert mm_matched < 1e-3, f"matched-precision spike mismatch fraction {mm_matched}"

    # Check 2: full-f32 reference mirroring the PyTorch forward. Spikes are binary, so
    # tolerate a small fraction of threshold-boundary flips caused by bf16 conv operands.
    ref_f = _reference_forward(x, w, b, decay)
    mm_f32 = float(jnp.mean((out != ref_f).astype(jnp.float32)))
    assert mm_f32 < 0.02, f"f32 reference spike mismatch fraction {mm_f32}"

    print("KERNEL_OK")
</pallas_src>

<mosaic_0001>
module attributes {stable_mosaic.version = 11 : i64} {
  func.func @_liaf_fused_kernel(%arg0: i32, %arg1: i32, %arg2: memref<1x1xf32, #tpu.memory_space<smem>>, %arg3: memref<8x144xbf16, #tpu.memory_space<vmem>>, %arg4: memref<8x1xf32, #tpu.memory_space<vmem>>, %arg5: memref<1x144x128xbf16, #tpu.memory_space<vmem>>, %arg6: memref<1x8x128xf32, #tpu.memory_space<vmem>>, %arg7: memref<8x128xf32, #tpu.memory_space<vmem>>) attributes {dimension_semantics = [#tpu.dimension_semantics<parallel>, #tpu.dimension_semantics<arbitrary>], iteration_bounds = array<i64: 1, 8>, scalar_prefetch = 0 : i64, scratch_operands = 1 : i64, tpu.core_type = #tpu.core_type<tc>, window_params = [{transform_indices = @transform_0, window_bounds = array<i64: 1, 1>}, {pipeline_mode = #tpu.pipeline_mode<synchronous>, transform_indices = @transform_1, window_bounds = array<i64: 8, 144>}, {pipeline_mode = #tpu.pipeline_mode<synchronous>, transform_indices = @transform_2, window_bounds = array<i64: 8, 1>}, {transform_indices = @transform_3, window_bounds = array<i64: 1, 144, 128>}, {transform_indices = @transform_4, window_bounds = array<i64: 1, 8, 128>}]} {
    %c0_i32 = arith.constant 0 : i32
    %0 = arith.cmpi eq, %arg1, %c0_i32 : i32
    %1 = arith.extui %0 : i1 to i32
    %c0_i32_0 = arith.constant 0 : i32
    %2 = arith.cmpi ne, %1, %c0_i32_0 : i32
    scf.if %2 {
      %cst_18 = arith.constant 0.000000e+00 : f32
      %25 = vector.broadcast %cst_18 : f32 to vector<8x128xf32>
      %c0_19 = arith.constant 0 : index
      %c0_20 = arith.constant 0 : index
      %26 = vector.load %arg7[%c0_19, %c0_20] : memref<8x128xf32, #tpu.memory_space<vmem>>, vector<8x128xf32>
      tpu.vector_store %arg7[%c0_19, %c0_20], %25 {strides = array<i32>} : memref<8x128xf32, #tpu.memory_space<vmem>>, vector<8x128xf32>,
    } else {
    }
    %c0 = arith.constant 0 : index
    %c0_1 = arith.constant 0 : index
    %3 = vector.load %arg3[%c0, %c0_1] : memref<8x144xbf16, #tpu.memory_space<vmem>>, vector<8x144xbf16>
    %c0_2 = arith.constant 0 : index
    %c0_3 = arith.constant 0 : index
    %c0_4 = arith.constant 0 : index
    %4 = vector.load %arg5[%c0_2, %c0_3, %c0_4] : memref<1x144x128xbf16, #tpu.memory_space<vmem>>, vector<1x144x128xbf16>
    %5 = vector.shape_cast %4 : vector<1x144x128xbf16> to vector<144x128xbf16>
    %cst = arith.constant dense<0.000000e+00> : vector<8x128xf32>
    %6 = tpu.matmul %3, %5, %cst {dimension_numbers = #tpu.dot_dimension_numbers<[1], [0], [0], [1], [0, 0, 1, 1], [], []>} : vector<8x144xbf16>, vector<144x128xbf16>, vector<8x128xf32> -> vector<8x128xf32>
    %c0_5 = arith.constant 0 : index
    %c0_6 = arith.constant 0 : index
    %7 = vector.load %arg4[%c0_5, %c0_6] : memref<8x1xf32, #tpu.memory_space<vmem>>, vector<8x1xf32>
    %8 = vector.broadcast %7 : vector<8x1xf32> to vector<8x128xf32>
    %9 = arith.addf %6, %8 : vector<8x128xf32>
    %c0_7 = arith.constant 0 : index
    %c0_8 = arith.constant 0 : index
    %10 = vector.load %arg7[%c0_7, %c0_8] : memref<8x128xf32, #tpu.memory_space<vmem>>, vector<8x128xf32>
    %11 = arith.addf %10, %9 : vector<8x128xf32>
    %cst_9 = arith.constant 5.000000e-01 : f32
    %12 = vector.broadcast %cst_9 : f32 to vector<8x128xf32>
    %13 = arith.cmpf ogt, %11, %12 : vector<8x128xf32>
    %14 = arith.extui %13 : vector<8x128xi1> to vector<8x128xi32>
    %15 = arith.sitofp %14 : vector<8x128xi32> to vector<8x128xf32>
    %c0_10 = arith.constant 0 : index
    %c0_11 = arith.constant 0 : index
    %c0_12 = arith.constant 0 : index
    %16 = vector.load %arg6[%c0_10, %c0_11, %c0_12] : memref<1x8x128xf32, #tpu.memory_space<vmem>>, vector<1x8x128xf32>
    %17 = vector.shape_cast %16 : vector<1x8x128xf32> to vector<8x128xf32>
    %18 = vector.shape_cast %15 : vector<8x128xf32> to vector<1x8x128xf32>
    tpu.vector_store %arg6[%c0_10, %c0_11, %c0_12], %18 {strides = array<i32>} : memref<1x8x128xf32, #tpu.memory_space<vmem>>, vector<1x8x128xf32>,
    %c0_13 = arith.constant 0 : index
    %c0_14 = arith.constant 0 : index
    %19 = memref.load %arg2[%c0_13, %c0_14] : memref<1x1xf32, #tpu.memory_space<smem>>
    %20 = vector.broadcast %19 : f32 to vector<8x128xf32>
    %21 = arith.mulf %11, %20 : vector<8x128xf32>
    %cst_15 = arith.constant 0.000000e+00 : f32
    %22 = vector.broadcast %cst_15 : f32 to vector<8x128xf32>
    %23 = arith.select %13, %22, %21 : vector<8x128xi1>, vector<8x128xf32>
    %c0_16 = arith.constant 0 : index
    %c0_17 = arith.constant 0 : index
    %24 = vector.load %arg7[%c0_16, %c0_17] : memref<8x128xf32, #tpu.memory_space<vmem>>, vector<8x128xf32>
    tpu.vector_store %arg7[%c0_16, %c0_17], %23 {strides = array<i32>} : memref<8x128xf32, #tpu.memory_space<vmem>>, vector<8x128xf32>,
    return
  }
  func.func @transform_0(%arg0: i32, %arg1: i32) -> (i32, i32) {
    %c0_i32 = arith.constant 0 : i32
    %c0_i32_0 = arith.constant 0 : i32
    %c0_i32_1 = arith.constant 0 : i32
    return %c0_i32, %c0_i32_0 : i32, i32
  }
  func.func @transform_1(%arg0: i32, %arg1: i32) -> (i32, i32) {
    %c0_i32 = arith.constant 0 : i32
    %c0_i32_0 = arith.constant 0 : i32
    %c0_i32_1 = arith.constant 0 : i32
    return %c0_i32, %c0_i32_0 : i32, i32
  }
  func.func @transform_2(%arg0: i32, %arg1: i32) -> (i32, i32) {
    %c0_i32 = arith.constant 0 : i32
    %c0_i32_0 = arith.constant 0 : i32
    %c0_i32_1 = arith.constant 0 : i32
    return %c0_i32, %c0_i32_0 : i32, i32
  }
  func.func @transform_3(%arg0: i32, %arg1: i32) -> (i32, i32, i32) {
    %c0_i32 = arith.constant 0 : i32
    %c0_i32_0 = arith.constant 0 : i32
    return %arg1, %c0_i32, %arg0 : i32, i32, i32
  }
  func.func @transform_4(%arg0: i32, %arg1: i32) -> (i32, i32, i32) {
    %c0_i32 = arith.constant 0 : i32
    %c0_i32_0 = arith.constant 0 : i32
    return %arg1, %c0_i32, %arg0 : i32, i32, i32
  }
}

</mosaic_0001>

<bundles_post_ra>
// kernel: liaf_conv_cell_forward.1
= control target key start
LH: loop header
LB: loop body
LE: loop exit
PB: predicated region body
PF: predicated region fallthrough
CT: control target
= control target key end

     0   :  { %s569_s17 = smov 0   ;;  %s571_s18 = smov 0   ;;  %s622_s0 = inlined_call_operand.<no memory space> [shape: f32[1,1], index: 0, kind: input, shape index: {}]   ;;  %s623_s1 = inlined_call_operand.vmem [shape: bf16[8,144], index: 1, kind: input, shape index: {}]   ;;  %s624_s2 = inlined_call_operand.vmem [shape: f32[8,1], index: 2, kind: input, shape index: {}]   ;;  %s625_s3 = inlined_call_operand.vmem [shape: bf16[8,144,128], index: 3, kind: input, shape index: {}]   ;;  %s626_s4 = inlined_call_operand.vmem [shape: f32[8,8,128], index: 4, kind: output, shape index: {}]  }
   0x1   :  { %9 = sst [smem:[#allocation3]] %s622_s0  ;;  %s573_s19 = smov 0  }
   0x2 LB: > { %s24_s0 = sadd.s32 1, %s532_s18  ;;  %p455_p0 = scmp.ge.s32.totalorder %s536_s19, 1  ;;  %s536_s19 = sphi %s573_s19, %s15_s19   ;;  %s532_s18 = sphi %s571_s18, %s628_s18   ;;  %s528_s17 = sphi %s569_s17, %s627_s17  }
   0x3   : > { %p25_p1 = scmp.ge.s32.totalorder %s24_s0, 8  ;;  %p182_p2 = scmp.lt.s32.totalorder %s536_s19, 9 }
   0x5   : > { %s630_s0 = smov (%p25_p1, %s24_s0), 0  ;;  %p183_p3 = pnand %p455_p0, %p182_p2 }
   0x6   : > { %p213_p4 = scmp.lt.s32.totalorder (!%p183_p3), %s528_s17, 7  ;;  %p458_p5 = scmp.ne.s32.totalorder (!%p183_p3), %s528_s17, 0 }
   0x7   : > { %186 = sbr.rel (%p183_p3) target bundleno = 258 (0x102), region = 36 }
   0xc   : > { %s214_s20 = scalar_select %p213_p4, %s528_s17, 7 }
   0xd   : > { %232 = sbr.rel (%p458_p5) target bundleno = 20 (0x14), region = 40 }
   0xe   : > { %s474_s21 = smul.u32 72, %s214_s20  ;;  %s457_s22 = sshll.u32 %s214_s20, 3 }
   0xf   : > { %s590_s25 = scalar_lea.vmem %s626_s4, %s457_s22 }
  0x10   : > { %s595_s28 = scalar_lea.vmem %s625_s3, %s474_s21 }
  0x12   : > { %v538_v0 = vmov 0.0  }
  0x13   : > { %233 = vst [vmem:[#allocation2] sm:$0xff] %v538_v0 }
  0x14 PF: > { %v503_v1 = vld [vmem:[%s595_s28 + $0x38] sm:$0xff]   ;;  %v539_v2 = vmov 0   ;;  %v504_v3 = vld [vmem:[%s595_s28 + $0x30] sm:$0xff]   ;;  %v505_v4 = vld [vmem:[%s595_s28 + $0x28] sm:$0xff]   ;;  %vm319_vm0 = vcmask 130048   ;;  %s369_s7 = sld [smem:[#allocation3]] }
  0x15   : > { %323 = vmatprep.subr.bf16.mxu0 %v539_v2  ;;  %502 = vset.pattern.permute.xlu0 %v539_v2  ;;  %v234_v5 = vld [vmem:[%s623_s1] sm:$0xff]  ;;  %v507_v9 = vld [vmem:[%s595_s28 + $0x18] sm:$0xff]   ;;  %v508_v10 = vld [vmem:[%s595_s28 + $0x10] sm:$0xff]   ;;  %v540_v24 = vmov 0.0  }
  0x16   : > { %324 = vmatpush1.bf16.msra.mxu0 %v503_v1  ;;  %v253_v6 = vld [vmem:[%s624_s2] sm:$0xff]  ;;  %v460_v8 = vcombine.high %v234_v5, %v234_v5  ;;  %v509_v11 = vld [vmem:[%s595_s28 + $0x8] sm:$0xff]   ;;  %v459_v14 = vcombine.low %v234_v5, %v234_v5 }
  0x17   : > { %325 = vmatprep.subr.bf16.mxu0 %v539_v2  ;;  %v506_v7 = vld [vmem:[%s595_s28 + $0x20] sm:$0xff]   ;;  %256 = vperm.xlu0 %502, %v253_v6  }
  0x18   : > { %470 = vmatprep.mubr.msk.bf16.mxu0 %vm319_vm0, %v460_v8  ;;  %v510_v12 = vld [vmem:[%s595_s28] sm:$0xff]  }
  0x19   : > { %v511_v13 = vld [vmem:[%s595_s28 + $0x40] sm:$0xff]  }
  0x1a   : > { %326 = vmatpush1.bf16.msra.mxu0 %v504_v3  ;;  %v363_v17 = vld [vmem:[#allocation2] sm:$0xff]  ;;  %v370_v19 = vstv %s369_s7 }
  0x1b   : > { %327 = vmatprep.subr.bf16.mxu0 %v539_v2 }
  0x1e   : > { %328 = vmatpush1.bf16.msra.mxu0 %v505_v4 }
  0x1f   : > { %329 = vmatprep.subr.bf16.mxu0 %v539_v2 }
  0x22   : > { %330 = vmatpush1.bf16.msra.mxu0 %v506_v7 }
  0x23   : > { %331 = vmatprep.subr.bf16.mxu0 %v539_v2 }
  0x26   : > { %332 = vmatpush1.bf16.msra.mxu0 %v507_v9 }
  0x27   : > { %333 = vmatprep.subr.bf16.mxu0 %v539_v2 }
  0x2a   : > { %334 = vmatpush1.bf16.msra.mxu0 %v508_v10 }
  0x2b   : > { %335 = vmatprep.subr.bf16.mxu0 %v539_v2 }
  0x2e   : > { %336 = vmatpush1.bf16.msra.mxu0 %v509_v11 }
  0x2f   : > { %337 = vmatprep.subr.bf16.mxu0 %v539_v2 }
  0x32   : > { %338 = vmatpush1.bf16.msra.mxu0 %v510_v12 }
  0x33   : > { %353 = vmatprep.subr.bf16.mxu0 %v539_v2 }
  0x36   : > { %354 = vmatpush2.bf16.msra.mxu0 %v511_v13 }
  0x39   : > { %356 = vmatmul.mubr.bf16.vlgmr.msra.gmra.mxu0 %v459_v14 }
  0x92   : > { %v257_v15 = vpop.permute.xlu0 %256 }
  0xf9   : > { %v357_v16 = vpop.f32.mrf.mxu0 }
  0xfa   : > { %v358_v18 = vadd.f32 %v357_v16, %v257_v15 }
  0xfb   : > { %v359_v20 = vpop.f32.mrf.mxu0 }
  0xfc   : > { %v364_v21 = vadd.f32 %v363_v17, %v358_v18 }
  0xfd   : > { %v360_v22 = vpop.f32.mrf.mxu0 }
  0xfe   : > { %vm365_vm1 = vcmp.gt.f32.partialorder %v364_v21, 0.5  ;;  %v371_v23 = vmul.f32 %v370_v19, %v364_v21 }
  0xff   : > { %v471_v25 = vsel %vm365_vm1, 1.0, %v540_v24  ;;  %v361_v26 = vpop.f32.mrf.mxu0 }
 0x100   : > { %368 = vst [vmem:[%s590_s25] sm:$0xff] %v471_v25  ;;  %v372_v27 = vsel %vm365_vm1, 0.0, %v371_v23 }
 0x101   : > { %373 = vst [vmem:[#allocation2] sm:$0xff] %v372_v27 }
 0x102 PF: > { %s15_s19 = sadd.s32 1, %s536_s19   ;;  %s627_s17 = smov %s532_s18 }
 0x103   : > { %p12_p6 = scmp.ge.s32.totalorder %s15_s19, 10   ;;  %s628_s18 = smov %s630_s0 }
 0x105   :  { %14 = sbr.rel (!%p12_p6) target bundleno = 2 (0x2), region = 70 }

</bundles_post_ra>
